<compile_context>
chip_gen: v7x
topology: tpu7x:2x2x1
jax: 0.10.0
libtpu: 0.0.40
codegen_flags: <defaults>
</compile_context>

<pallas_src>
import jax
import jax.numpy as jnp
from jax.experimental import pallas as pl
from jax.experimental.pallas import tpu as pltpu


def _my_add_kernel(x_ref, w_ref, o_ref):
    # x_ref: (R, HW) tile, w_ref: (1, HW) resident weight -> broadcast add (VPU).
    o_ref[...] = x_ref[...] + w_ref[...]


def _pick_row_block(n_rows: int, row_bytes: int, itemsize: int) -> int:
    """Largest row-block that is sublane-aligned and keeps tiles ~4 MiB."""
    # Sub-32-bit dtypes pack along sublanes: 8 rows/vreg f32, 16 bf16, 32 int8/fp8.
    packing = max(1, 4 // max(itemsize, 1))
    sub = 8 * packing
    if n_rows <= sub:
        # Block equals the full dim -> always a legal block shape.
        return n_rows
    # ~4 MiB per tile => double-buffered x + out tiles ~16 MiB, safely inside
    # the 32 MiB scoped-VMEM default on v5e/v6e/v7x.
    target_tile_bytes = 4 * 1024 * 1024
    rows = max(sub, (target_tile_bytes // max(row_bytes, 1)) // sub * sub)
    return min(rows, n_rows)


def my_add(x: jax.Array, weight: jax.Array) -> jax.Array:
    """out = x + weight, weight broadcast over the leading (B, C) axes of x."""
    B, C, H, W = x.shape
    assert weight.shape == (H, W)

    BC, HW = B * C, H * W
    itemsize = jnp.dtype(x.dtype).itemsize

    # Lane-dense 2D layout: rows = (b, c) planes, lanes = flattened (h, w).
    x2 = x.reshape(BC, HW)
    w2 = weight.astype(x.dtype).reshape(1, HW)

    block_rows = _pick_row_block(BC, HW * itemsize, itemsize)
    grid_rows = pl.cdiv(BC, block_rows)

    out2 = pl.pallas_call(
        _my_add_kernel,
        out_shape=jax.ShapeDtypeStruct((BC, HW), x.dtype),
        grid_spec=pl.GridSpec(
            grid=(grid_rows,),
            in_specs=[
                # Big lane-dense row-block of x per grid step.
                pl.BlockSpec((block_rows, HW), lambda i: (i, 0)),
                # Weight: same (1, HW) block every step -> resident in VMEM.
                pl.BlockSpec((1, HW), lambda i: (0, 0)),
            ],
            out_specs=pl.BlockSpec((block_rows, HW), lambda i: (i, 0)),
        ),
        compiler_params=pltpu.CompilerParams(
            dimension_semantics=("parallel",),
            # Explicit, conservative limit that holds on v7x (64 MiB physical)
            # as well as v5e/v6e (128 MiB).
            vmem_limit_bytes=32 * 1024 * 1024,
        ),
    )(x2, w2)

    return out2.reshape(B, C, H, W)


if __name__ == "__main__":
    key = jax.random.PRNGKey(0)
    kx, kw = jax.random.split(key)

    B, C, H, W = 2, 4, 16, 16
    x = jax.random.normal(kx, (B, C, H, W), dtype=jnp.float32)
    # Deterministic stand-in for torch.rand(size) with size=(H, W): U[0, 1).
    weight = jax.random.uniform(kw, (H, W), dtype=jnp.float32)

    out = my_add(x, weight)
    out = jax.block_until_ready(out)

    # Reference check against plain JAX broadcasting add.
    ref = x + weight
    assert out.shape == (B, C, H, W)
    assert jnp.allclose(out, ref, atol=1e-6), "mismatch vs reference"

    print("KERNEL_OK")
</pallas_src>

<mosaic_0001>
module attributes {stable_mosaic.version = 11 : i64} {
  func.func @_my_add_kernel(%arg0: i32, %arg1: memref<8x256xf32, #tpu.memory_space<vmem>>, %arg2: memref<1x256xf32, #tpu.memory_space<vmem>>, %arg3: memref<8x256xf32, #tpu.memory_space<vmem>>) attributes {dimension_semantics = [#tpu.dimension_semantics<parallel>], iteration_bounds = array<i64: 1>, scalar_prefetch = 0 : i64, scratch_operands = 0 : i64, tpu.core_type = #tpu.core_type<tc>, window_params = [{transform_indices = @transform_0, window_bounds = array<i64: 8, 256>}, {pipeline_mode = #tpu.pipeline_mode<synchronous>, transform_indices = @transform_1, window_bounds = array<i64: 1, 256>}, {transform_indices = @transform_2, window_bounds = array<i64: 8, 256>}]} {
    %c0 = arith.constant 0 : index
    %c0_0 = arith.constant 0 : index
    %0 = vector.load %arg1[%c0, %c0_0] : memref<8x256xf32, #tpu.memory_space<vmem>>, vector<8x256xf32>
    %c0_1 = arith.constant 0 : index
    %c0_2 = arith.constant 0 : index
    %1 = vector.load %arg2[%c0_1, %c0_2] : memref<1x256xf32, #tpu.memory_space<vmem>>, vector<1x256xf32>
    %2 = vector.broadcast %1 : vector<1x256xf32> to vector<8x256xf32>
    %3 = arith.addf %0, %2 : vector<8x256xf32>
    %c0_3 = arith.constant 0 : index
    %c0_4 = arith.constant 0 : index
    %4 = vector.load %arg3[%c0_3, %c0_4] : memref<8x256xf32, #tpu.memory_space<vmem>>, vector<8x256xf32>
    tpu.vector_store %arg3[%c0_3, %c0_4], %3 {strides = array<i32>} : memref<8x256xf32, #tpu.memory_space<vmem>>, vector<8x256xf32>,
    return
  }
  func.func @transform_0(%arg0: i32) -> (i32, i32) {
    %c0_i32 = arith.constant 0 : i32
    %c0_i32_0 = arith.constant 0 : i32
    return %arg0, %c0_i32 : i32, i32
  }
  func.func @transform_1(%arg0: i32) -> (i32, i32) {
    %c0_i32 = arith.constant 0 : i32
    %c0_i32_0 = arith.constant 0 : i32
    %c0_i32_1 = arith.constant 0 : i32
    return %c0_i32, %c0_i32_0 : i32, i32
  }
  func.func @transform_2(%arg0: i32) -> (i32, i32) {
    %c0_i32 = arith.constant 0 : i32
    %c0_i32_0 = arith.constant 0 : i32
    return %arg0, %c0_i32 : i32, i32
  }
}

</mosaic_0001>

<bundles_post_ra>
// kernel: tpu_custom_call.1
= control target key start
LH: loop header
LB: loop body
LE: loop exit
PB: predicated region body
PF: predicated region fallthrough
CT: control target
= control target key end

     0   :  { %7 = vsyncpa [#allocation3], 0  ;;  %s151_s0 = inlined_call_operand.hbm [shape: f32[8,256], index: 0, kind: input, shape index: {}]   ;;  %s152_s1 = inlined_call_operand.vmem [shape: f32[1,256], index: 1, kind: input, shape index: {}]   ;;  %s153_s2 = inlined_call_operand.hbm [shape: f32[8,256], index: 2, kind: output, shape index: {}]  }
   0x1   :  { %8 = vsyncpa [#allocation4], 0  ;;  %s107_s9 = smov [#allocation2]   ;;  %s59_s13 = scalar_lea.hbm %s151_s0, 256 }
   0x2   :  { %s15_s10 = sshll.u32 %s107_s9, 4  ;;  %p60_p0 = scmp.ne.s32.totalorder %s151_s0, %s59_s13  ;;  %s16_s10 = int_to_ptr.vmem [resolvable:$true] %s15_s10 }
   0x3   :  { %p63_p1 = scmp.lt.u32.totalorder %s59_s13, %s151_s0 }
   0x5   :  { %p65_p2 = pnand %p63_p1, %p60_p0 }
   0x7   :  { %68 = shalt.err (!%p65_p2)
}
   0x8   :  { %s69_s18 = scalar_lea.vmem %s16_s10, 256  ;;  %p74_p4 = scmp.lt.s32.totalorder %s16_s10, %s16_s10 }
   0x9   :  { %p70_p3 = scmp.ne.s32.totalorder %s16_s10, %s69_s18  ;;  %p75_p5 = scmp.lt.s32.totalorder %s69_s18, %s69_s18 }
   0xb   :  { %p76_p6 = por %p75_p5, %p74_p4 }
   0xd   :  { %p77_p7 = pnand %p76_p6, %p70_p3 }
   0xf   :  { %80 = shalt.err (!%p77_p7)
}
  0x10   :  { %18 = dma.hbm_to_vmem [thread:$0]  %s151_s0, 256, %s16_s10, [#allocation3]  }
  0x11   :  { %103 = dma.done.wait [#allocation3], 256  }
  0x12   :  { %104 = vsyncadd [#allocation3], 4294967040  ;;  %v28_v0 = vlaneseq  ;;  %v24_v4 = vld [vmem:[#allocation2] sm:$0xff]  ;;  %v25_v6 = vld [vmem:[#allocation2 + $0x8] sm:$0xff]  ;;  %s108_s23 = smov [#allocation5]  }
  0x13   :  { %v26_v5 = vld [vmem:[%s152_s1] sm:$0x3]  ;;  %s48_s24 = sshll.u32 %s108_s23, 4  ;;  %s49_s24 = int_to_ptr.vmem [resolvable:$true] %s48_s24 }
  0x14   :  { %v29_v1 = vshrl.u32 %v28_v0, 7  ;;  %s81_s0 = scalar_lea.vmem %s49_s24, 256  ;;  %p86_p9 = scmp.lt.s32.totalorder %s49_s24, %s49_s24 }
  0x15   :  { %p82_p8 = scmp.ne.s32.totalorder %s49_s24, %s81_s0  ;;  %p87_p10 = scmp.lt.s32.totalorder %s81_s0, %s81_s0 }
  0x16   :  { %v30_v2 = vsub.s32 0, %v29_v1  ;;  %v34_v3 = vsub.s32 1, %v29_v1 }
  0x17   :  { %p88_p11 = por %p87_p10, %p86_p9 }
  0x18   :  { %v31_v7 = vrot.slane %v26_v5, %v30_v2  ;;  %v35_v8 = vrot.slane %v26_v5, %v34_v3 }
  0x19   :  { %p89_p12 = pnand %p88_p11, %p82_p8 }
  0x1a   :  { %v38_v9 = vadd.f32 %v31_v7, %v24_v4  ;;  %v39_v10 = vadd.f32 %v35_v8, %v25_v6 }
  0x1c   :  { %40 = vst [vmem:[#allocation5] sm:$0xff] %v38_v9  ;;  %41 = vst [vmem:[#allocation5 + $0x8] sm:$0xff] %v39_v10 }
  0x1d   :  { %92 = shalt.err (!%p89_p12)
}
  0x1e   :  { %s93_s1 = scalar_lea.hbm %s153_s2, 256 }
  0x1f   :  { %p94_p13 = scmp.ne.s32.totalorder %s153_s2, %s93_s1  ;;  %p97_p0 = scmp.lt.u32.totalorder %s93_s1, %s153_s2 }
  0x21   :  { %p99_p1 = pnand %p97_p0, %p94_p13 }
  0x23   :  { %102 = shalt.err (!%p99_p1)
}
  0x24   :  { %51 = dma.vmem_to_hbm [thread:$0]  %s49_s24, 256, %s153_s2, [#allocation4]  }
  0x25   :  { %105 = dma.done.wait [#allocation4], 256  }
  0x26   :  { %106 = vsyncadd [#allocation4], 4294967040 }
  0x27   :  { %55 = vsyncpa [#allocation3], 1 }
  0x28   :  { %56 = vsyncpa [#allocation4], 1 }

</bundles_post_ra>
